<compile_context>
chip_gen: v5e
topology: v5e:2x2
jax: 0.10.0
libtpu: 0.0.40
codegen_flags: <defaults>
</compile_context>

<pallas_src>
import functools

import jax
import jax.numpy as jnp
from jax.experimental import pallas as pl
from jax.experimental.pallas import tpu as pltpu


def _sigmoid(z):
    return 1.0 / (1.0 + jnp.exp(-z))


# ---------------------------------------------------------------------------
# Single-pass kernel: one (Bt, C, HW) block per grid step.
# ---------------------------------------------------------------------------
def se_block_kernel(x_ref, w1_ref, w2_ref, o_ref, *, inv_hw):
    # Squeeze: global average pool, f32 accumulation only (no full f32 copy).
    y = jnp.sum(x_ref[...], axis=-1, dtype=jnp.float32) * inv_hw          # (Bt, C)
    # Excitation: FC -> ReLU -> FC -> sigmoid (weights already f32, resident).
    h = jnp.maximum(
        jnp.dot(y, w1_ref[...], preferred_element_type=jnp.float32), 0.0)  # (Bt, Cr)
    s = _sigmoid(jnp.dot(h, w2_ref[...], preferred_element_type=jnp.float32))  # (Bt, C)
    # Scale: re-index the input ref (second read of the same VMEM tile) so no
    # multi-MiB temporary needs to stay live across the reduction.
    o_ref[...] = x_ref[...] * s.astype(o_ref.dtype)[:, :, None]


# ---------------------------------------------------------------------------
# Two-pass fallback.
# Pass 1: per-channel gates s(B, C, 1) via f32 partial sums over HW chunks.
# Pass 2: rescale x chunk-by-chunk with a fully parallel grid.
# ---------------------------------------------------------------------------
def se_gate_kernel(x_ref, w1_ref, w2_ref, s_ref, acc_ref, *, inv_hw, hw, hw_chunk):
    c = pl.program_id(1)

    @pl.when(c == 0)
    def _():
        acc_ref[...] = jnp.zeros_like(acc_ref)

    # Mask the ragged tail of the last chunk (reads past HW are padding).
    pos = c * hw_chunk + jax.lax.broadcasted_iota(jnp.int32, x_ref.shape, 2)
    xm = jnp.where(pos < hw, x_ref[...], 0)
    acc_ref[...] += jnp.sum(xm, axis=-1, dtype=jnp.float32)               # (1, C)

    @pl.when(c == pl.num_programs(1) - 1)
    def _():
        y = acc_ref[...] * inv_hw                                         # (1, C)
        h = jnp.maximum(
            jnp.dot(y, w1_ref[...], preferred_element_type=jnp.float32), 0.0)
        s = _sigmoid(jnp.dot(h, w2_ref[...], preferred_element_type=jnp.float32))
        s_ref[...] = s[:, :, None]                                        # (1, C, 1)


def se_scale_kernel(x_ref, s_ref, o_ref):
    # s block is (1, C, 1) -> broadcasts over the lane (HW) axis.
    o_ref[...] = x_ref[...] * s_ref[...].astype(o_ref.dtype)


# ---------------------------------------------------------------------------
# Wrapper helpers: generation-aware VMEM budgeting.
# ---------------------------------------------------------------------------
def _vmem_capacity_bytes():
    try:
        return int(pltpu.get_tpu_info().vmem_capacity_bytes)
    except Exception:
        return 64 << 20                     # conservative: v7x per-TensorCore VMEM


def _budget_and_capacity():
    cap = _vmem_capacity_bytes()
    kind = ""
    try:
        kind = jax.devices()[0].device_kind.lower()
    except Exception:
        pass
    if "v5" in kind:
        return 4 << 20, cap                 # v5e: larger blocks buy little at ~0.82 TB/s
    if cap <= 96 << 20:
        return 6 << 20, cap                 # v7x-class: only 64 MiB physical VMEM
    return 7 << 20, cap                     # v6e-class: 128 MiB physical VMEM


def _vmem_limit_bytes(live_block_bytes, cap):
    # Double-buffered live blocks + compiler-scratch margin, clamped to physical.
    limit = 2 * live_block_bytes + (8 << 20)
    limit = max(limit, 16 << 20)
    return min(limit, cap - (4 << 20))


def _pick_block_batch(B, per_batch_bytes, budget):
    """Largest Bt dividing B that fits the budget and keeps >= 2 grid steps."""
    min_steps = 2 if B >= 2 else 1
    bt = 1
    for cand in range(1, B + 1):
        if B % cand:
            continue
        if B // cand < min_steps:
            continue
        if cand * per_batch_bytes > budget:
            continue
        bt = cand
    return bt


# ---------------------------------------------------------------------------
# Public entry point.
# ---------------------------------------------------------------------------
def se_block(x, w1, w2, *, force_two_pass=False):
    """x: (B, C, H, W).  w1 = fc1.weight.T (C, C//r),  w2 = fc2.weight.T (C//r, C)."""
    B, C, H, W = x.shape
    HW = H * W
    Cr = w1.shape[1]
    itemsize = jnp.dtype(x.dtype).itemsize
    inv_hw = 1.0 / HW

    x_flat = x.reshape(B, C, HW)
    w1f = w1.astype(jnp.float32)            # pre-cast once: no per-step astype
    w2f = w2.astype(jnp.float32)
    w_bytes = (C * Cr + Cr * C) * 4

    budget, vmem_cap = _budget_and_capacity()
    per_batch_bytes = C * HW * itemsize

    use_two_pass = force_two_pass or per_batch_bytes > budget
    if B == 1 and HW >= 256 and per_batch_bytes > (2 << 20):
        use_two_pass = True                 # keep both v7x TensorCores busy at B == 1
    if HW < 128:
        use_two_pass = False
        # TODO(synk): if C*HW with HW < 128 ever exceeds the VMEM budget, add a
        # channel-chunked variant; not a realistic SE configuration.

    if not use_two_pass:
        # ---------------- single-pass path ----------------
        Bt = _pick_block_batch(B, per_batch_bytes, budget)
        grid = (B // Bt,)
        x_block_bytes = Bt * per_batch_bytes
        cost = pl.CostEstimate(
            flops=2 * B * C * HW + 4 * B * C * Cr,
            transcendentals=B * C,
            bytes_accessed=2 * B * C * HW * itemsize + w_bytes,
        )
        out = pl.pallas_call(
            functools.partial(se_block_kernel, inv_hw=inv_hw),
            out_shape=jax.ShapeDtypeStruct((B, C, HW), x.dtype),
            grid_spec=pltpu.PrefetchScalarGridSpec(
                num_scalar_prefetch=0,
                grid=grid,
                in_specs=[
                    pl.BlockSpec((Bt, C, HW), lambda b: (b, 0, 0)),
                    pl.BlockSpec((C, Cr), lambda b: (0, 0)),     # resident weights
                    pl.BlockSpec((Cr, C), lambda b: (0, 0)),     # resident weights
                ],
                out_specs=pl.BlockSpec((Bt, C, HW), lambda b: (b, 0, 0)),
            ),
            compiler_params=pltpu.CompilerParams(
                dimension_semantics=("parallel",),
                vmem_limit_bytes=_vmem_limit_bytes(2 * x_block_bytes + w_bytes, vmem_cap),
            ),
            cost_estimate=cost,
        )(x_flat, w1f, w2f)
        return out.reshape(B, C, H, W)

    # ---------------- two-pass fallback ----------------
    hwc = max(128, (budget // (C * itemsize)) // 128 * 128)
    hwc = min(hwc, (HW // 128) * 128)       # largest 128-multiple <= HW
    if B == 1:
        cap_hwc = ((HW - 1) // 128) * 128   # force >= 2 chunks for megacore
        if cap_hwc >= 128:
            hwc = min(hwc, cap_hwc)
    n_chunks = pl.cdiv(HW, hwc)
    chunk_bytes = C * hwc * itemsize

    gate_cost = pl.CostEstimate(
        flops=2 * B * C * HW + 4 * B * C * Cr,
        transcendentals=B * C,
        bytes_accessed=B * C * HW * itemsize + w_bytes + B * C * 4,
    )
    s = pl.pallas_call(
        functools.partial(se_gate_kernel, inv_hw=inv_hw, hw=HW, hw_chunk=hwc),
        out_shape=jax.ShapeDtypeStruct((B, C, 1), jnp.float32),
        grid_spec=pltpu.PrefetchScalarGridSpec(
            num_scalar_prefetch=0,
            grid=(B, n_chunks),
            in_specs=[
                pl.BlockSpec((1, C, hwc), lambda b, c: (b, 0, c)),
                pl.BlockSpec((C, Cr), lambda b, c: (0, 0)),
                pl.BlockSpec((Cr, C), lambda b, c: (0, 0)),
            ],
            out_specs=pl.BlockSpec((1, C, 1), lambda b, c: (b, 0, 0)),
            scratch_shapes=[pltpu.VMEM((1, C), jnp.float32)],
        ),
        compiler_params=pltpu.CompilerParams(
            dimension_semantics=("parallel", "arbitrary"),
            vmem_limit_bytes=_vmem_limit_bytes(chunk_bytes + w_bytes + C * 4, vmem_cap),
        ),
        cost_estimate=gate_cost,
    )(x_flat, w1f, w2f)

    scale_cost = pl.CostEstimate(
        flops=B * C * HW,
        transcendentals=0,
        bytes_accessed=2 * B * C * HW * itemsize + B * C * 4,
    )
    out = pl.pallas_call(
        se_scale_kernel,
        out_shape=jax.ShapeDtypeStruct((B, C, HW), x.dtype),
        grid_spec=pltpu.PrefetchScalarGridSpec(
            num_scalar_prefetch=0,
            grid=(B, n_chunks),
            in_specs=[
                pl.BlockSpec((1, C, hwc), lambda b, c: (b, 0, c)),
                pl.BlockSpec((1, C, 1), lambda b, c: (b, 0, 0)),
            ],
            out_specs=pl.BlockSpec((1, C, hwc), lambda b, c: (b, 0, c)),
        ),
        compiler_params=pltpu.CompilerParams(
            dimension_semantics=("parallel", "parallel"),
            vmem_limit_bytes=_vmem_limit_bytes(2 * chunk_bytes + C * 4, vmem_cap),
        ),
        cost_estimate=scale_cost,
    )(x_flat, s)
    return out.reshape(B, C, H, W)


def se_block_reference(x, w1, w2):
    y = jnp.mean(x.astype(jnp.float32), axis=(2, 3))            # (B, C)
    h = jnp.maximum(y @ w1.astype(jnp.float32), 0.0)            # (B, C//r)
    s = jax.nn.sigmoid(h @ w2.astype(jnp.float32))              # (B, C)
    return x * s.astype(x.dtype)[:, :, None, None]


if __name__ == "__main__":
    key = jax.random.PRNGKey(0)
    kx, k1, k2, kx2 = jax.random.split(key, 4)

    # Shapes consistent with SEBlock(channels=64, reduction=16).
    B, C, H, W = 2, 64, 16, 16
    Cr = C // 16

    x = jax.random.normal(kx, (B, C, H, W), dtype=jnp.float32)
    # PyTorch nn.Linear weights are (out, in); pass the transposed versions so
    # the kernel does plain left-matmuls (x @ W.T == x @ w_transposed).
    w1 = jax.random.normal(k1, (C, Cr), dtype=jnp.float32) * 0.1   # fc1.weight.T
    w2 = jax.random.normal(k2, (Cr, C), dtype=jnp.float32) * 0.1   # fc2.weight.T

    # 1) Single-pass path (HW = 256, multiple of 128).
    out = jax.block_until_ready(se_block(x, w1, w2))
    ref = se_block_reference(x, w1, w2)
    assert out.shape == (B, C, H, W)
    assert jnp.allclose(out, ref, atol=1e-5, rtol=1e-5), "single-pass mismatch"

    # 2) Two-pass fallback, exercised explicitly with a ragged HW (144 % 128 != 0).
    B2, H2, W2 = 1, 12, 12
    x2 = jax.random.normal(kx2, (B2, C, H2, W2), dtype=jnp.float32)
    out2 = jax.block_until_ready(se_block(x2, w1, w2, force_two_pass=True))
    ref2 = se_block_reference(x2, w1, w2)
    assert out2.shape == (B2, C, H2, W2)
    assert jnp.allclose(out2, ref2, atol=1e-5, rtol=1e-5), "two-pass mismatch"

    print("KERNEL_OK")
</pallas_src>

<mosaic_0001>
module attributes {stable_mosaic.version = 11 : i64} {
  func.func @se_block_kernel(%arg0: i32, %arg1: memref<1x64x256xf32, #tpu.memory_space<vmem>>, %arg2: memref<64x4xf32, #tpu.memory_space<vmem>>, %arg3: memref<4x64xf32, #tpu.memory_space<vmem>>, %arg4: memref<1x64x256xf32, #tpu.memory_space<vmem>>) attributes {dimension_semantics = [#tpu.dimension_semantics<parallel>], iteration_bounds = array<i64: 2>, scalar_prefetch = 0 : i64, scratch_operands = 0 : i64, tpu.core_type = #tpu.core_type<tc>, window_params = [{transform_indices = @transform_0, window_bounds = array<i64: 1, 64, 256>}, {pipeline_mode = #tpu.pipeline_mode<synchronous>, transform_indices = @transform_1, window_bounds = array<i64: 64, 4>}, {pipeline_mode = #tpu.pipeline_mode<synchronous>, transform_indices = @transform_2, window_bounds = array<i64: 4, 64>}, {transform_indices = @transform_3, window_bounds = array<i64: 1, 64, 256>}]} {
    %c0 = arith.constant 0 : index
    %c0_0 = arith.constant 0 : index
    %c0_1 = arith.constant 0 : index
    %0 = vector.load %arg1[%c0, %c0_0, %c0_1] : memref<1x64x256xf32, #tpu.memory_space<vmem>>, vector<1x64x256xf32>
    %cst = arith.constant dense<0.000000e+00> : vector<1x64xf32>
    %1 = vector.multi_reduction <add>, %0, %cst [2] : vector<1x64x256xf32> to vector<1x64xf32>
    %cst_2 = arith.constant 3.906250e-03 : f32
    %2 = vector.broadcast %cst_2 : f32 to vector<1x64xf32>
    %3 = arith.mulf %1, %2 : vector<1x64xf32>
    %c0_3 = arith.constant 0 : index
    %c0_4 = arith.constant 0 : index
    %4 = vector.load %arg2[%c0_3, %c0_4] : memref<64x4xf32, #tpu.memory_space<vmem>>, vector<64x4xf32>
    %cst_5 = arith.constant dense<0.000000e+00> : vector<1x4xf32>
    %5 = tpu.matmul %3, %4, %cst_5 {dimension_numbers = #tpu.dot_dimension_numbers<[1], [0], [0], [1], [0, 0, 1, 1], [], []>} : vector<1x64xf32>, vector<64x4xf32>, vector<1x4xf32> -> vector<1x4xf32>
    %cst_6 = arith.constant 0.000000e+00 : f32
    %6 = vector.broadcast %cst_6 : f32 to vector<1x4xf32>
    %7 = arith.maximumf %5, %6 : vector<1x4xf32>
    %c0_7 = arith.constant 0 : index
    %c0_8 = arith.constant 0 : index
    %8 = vector.load %arg3[%c0_7, %c0_8] : memref<4x64xf32, #tpu.memory_space<vmem>>, vector<4x64xf32>
    %cst_9 = arith.constant dense<0.000000e+00> : vector<1x64xf32>
    %9 = tpu.matmul %7, %8, %cst_9 {dimension_numbers = #tpu.dot_dimension_numbers<[1], [0], [0], [1], [0, 0, 1, 1], [], []>} : vector<1x4xf32>, vector<4x64xf32>, vector<1x64xf32> -> vector<1x64xf32>
    %cst_10 = arith.constant 0.000000e+00 : f32
    %10 = vector.broadcast %cst_10 : f32 to vector<1x64xf32>
    %11 = arith.subf %10, %9 : vector<1x64xf32>
    %12 = math.exp %11 : vector<1x64xf32>
    %cst_11 = arith.constant 1.000000e+00 : f32
    %13 = vector.broadcast %cst_11 : f32 to vector<1x64xf32>
    %14 = arith.addf %13, %12 : vector<1x64xf32>
    %cst_12 = arith.constant 1.000000e+00 : f32
    %15 = vector.broadcast %cst_12 : f32 to vector<1x64xf32>
    %16 = arith.divf %15, %14 : vector<1x64xf32>
    %c0_13 = arith.constant 0 : index
    %c0_14 = arith.constant 0 : index
    %c0_15 = arith.constant 0 : index
    %17 = vector.load %arg1[%c0_13, %c0_14, %c0_15] : memref<1x64x256xf32, #tpu.memory_space<vmem>>, vector<1x64x256xf32>
    %18 = vector.shape_cast %16 : vector<1x64xf32> to vector<1x64x1xf32>
    %19 = vector.broadcast %18 : vector<1x64x1xf32> to vector<1x64x256xf32>
    %20 = arith.mulf %17, %19 : vector<1x64x256xf32>
    %c0_16 = arith.constant 0 : index
    %c0_17 = arith.constant 0 : index
    %c0_18 = arith.constant 0 : index
    %21 = vector.load %arg4[%c0_16, %c0_17, %c0_18] : memref<1x64x256xf32, #tpu.memory_space<vmem>>, vector<1x64x256xf32>
    tpu.vector_store %arg4[%c0_16, %c0_17, %c0_18], %20 {strides = array<i32>} : memref<1x64x256xf32, #tpu.memory_space<vmem>>, vector<1x64x256xf32>,
    return
  }
  func.func @transform_0(%arg0: i32) -> (i32, i32, i32) {
    %c0_i32 = arith.constant 0 : i32
    %c0_i32_0 = arith.constant 0 : i32
    %c0_i32_1 = arith.constant 0 : i32
    return %arg0, %c0_i32, %c0_i32_0 : i32, i32, i32
  }
  func.func @transform_1(%arg0: i32) -> (i32, i32) {
    %c0_i32 = arith.constant 0 : i32
    %c0_i32_0 = arith.constant 0 : i32
    %c0_i32_1 = arith.constant 0 : i32
    return %c0_i32, %c0_i32_0 : i32, i32
  }
  func.func @transform_2(%arg0: i32) -> (i32, i32) {
    %c0_i32 = arith.constant 0 : i32
    %c0_i32_0 = arith.constant 0 : i32
    %c0_i32_1 = arith.constant 0 : i32
    return %c0_i32, %c0_i32_0 : i32, i32
  }
  func.func @transform_3(%arg0: i32) -> (i32, i32, i32) {
    %c0_i32 = arith.constant 0 : i32
    %c0_i32_0 = arith.constant 0 : i32
    %c0_i32_1 = arith.constant 0 : i32
    return %arg0, %c0_i32, %c0_i32_0 : i32, i32, i32
  }
}

</mosaic_0001>

<bundles_post_ra>
// kernel: tpu_custom_call.1
= control target key start
LH: loop header
LB: loop body
LE: loop exit
PB: predicated region body
PF: predicated region fallthrough
CT: control target
= control target key end

     0   :  { %8 = vsyncpa [#allocation3], 0  ;;  %s973_s0 = inlined_call_operand.hbm [shape: f32[2,64,256], index: 0, kind: input, shape index: {}]   ;;  %s974_s1 = inlined_call_operand.vmem [shape: f32[64,4], index: 1, kind: input, shape index: {}]   ;;  %s975_s2 = inlined_call_operand.vmem [shape: f32[4,64], index: 2, kind: input, shape index: {}]   ;;  %s976_s3 = inlined_call_operand.hbm [shape: f32[2,64,256], index: 3, kind: output, shape index: {}]  }
   0x1   :  { %10 = vsyncpa [#allocation3 + $0x1], 0 }
   0x2   :  { %11 = vsyncpa [#allocation4], 0 }
   0x3   :  { %13 = vsyncpa [#allocation4 + $0x1], 0  ;;  %s732_s12 = smov 0   ;;  %s734_s13 = smov 0  }
   0x4   :  { %s736_s14 = smov 0   ;;  %s738_s15 = smov 0  }
   0x5 LB: > { %s753_s16 = sadd.s32 4294967295, %s706_s15   ;;  %s528_s17 = sadd.s32 4294967294, %s706_s15   ;;  %s706_s15 = sphi %s738_s15, %s986_s15   ;;  %s702_s14 = sphi %s736_s14, %s985_s14   ;;  %s698_s13 = sphi %s734_s13, %s984_s13   ;;  %s694_s12 = sphi %s732_s12, %s983_s12  }
   0x6   : > { %s757_s18 = sadd.s32 1, %s706_s15   ;;  %s26_s19 = sadd.s32 1, %s702_s14 }
   0x7   : > { %s23_s20 = ssub.s32 %s706_s15, %s757_s18  ;;  %p33_p0 = scmp.ne.s32.totalorder %s702_s14, %s698_s13 }
   0x8   : > { %p24_p1 = scmp.eq.s32.totalorder %s23_s20, 0  ;;  %p34_p2 = scmp.eq.s32.totalorder %s706_s15, 0 }
   0x9   : > { %p39_p3 = scmp.ne.s32.totalorder %s698_s13, %s694_s12  ;;  %p40_p4 = scmp.eq.s32.totalorder %s753_s16, 0 }
   0xa   : > { %s769_s21 = scalar_select %p24_p1, %s702_s14, %s26_s19  }
   0xb   : > { %p771_p5 = por %p34_p2, %p33_p0  ;;  %p775_p6 = por %p40_p4, %p39_p3 }
   0xc   : > { %p105_p7 = scmp.eq.s32.totalorder %s753_s16, 1  ;;  %p111_p8 = scmp.eq.s32.totalorder %s528_s17, 1 }
   0xd   : > { %p559_p10 = scmp.lt.s32.totalorder %s706_s15, 2  ;;  %s137_s26 = sand.u32 1, %s702_s14  }
   0xe   : > { %p782_p11 = por %p105_p7, %p33_p0  ;;  %p786_p12 = por %p111_p8, %p39_p3 }
   0xf   : > { %s545_s27 = sshll.u32 %s706_s15, 7  ;;  %s531_s28 = sshll.u32 %s137_s26, 7 }
  0x10   : > { %s146_s4 = scalar_lea.hbm %s973_s0, %s545_s27  ;;  %s141_s6 = scalar_lea.vmem [#allocation2], %s531_s28 }
  0x11   : > { %s147_s5 = sshll.u32 %s146_s4, 4  ;;  %s149_s7 = sshll.u32 %s141_s6, 4  ;;  %s148_s5 = int_to_ptr.hbm [resolvable:$true] %s147_s5  ;;  %s150_s7 = int_to_ptr.vmem [resolvable:$true] %s149_s7 }
  0x12   : > { %p797_p13 = pnand %p559_p10, %p771_p5  ;;  %p534_p0 = scmp.ge.s32.totalorder %s706_s15, 1 }
  0x13   : > { %p157_p1 = scmp.lt.s32.totalorder %s706_s15, 3  ;;  %s138_s9 = scalar_lea.sflag [#allocation3], %s137_s26 }
  0x14   : > { %s610_s10 = sshra.s32 %s148_s5, 4  ;;  %p614_p3 = pneg %p797_p13  ;;  %s611_s10 = int_to_ptr.hbm [resolvable:$true] %s610_s10 }
  0x15   : > { %s612_s11 = scalar_lea.hbm %s611_s10, 128  ;;  %s617_s20 = scalar_lea.hbm %s973_s0, 256 }
  0x16   : > { %p613_p2 = scmp.ne.s32.totalorder %s611_s10, %s612_s11  ;;  %p618_p5 = scmp.lt.s32.totalorder %s611_s10, %s973_s0 }
  0x17   : > { %p619_p8 = scmp.lt.s32.totalorder %s617_s20, %s612_s11 }
  0x18   : > { %p615_p4 = pnand %p614_p3, %p613_p2 }
  0x19   : > { %p620_p10 = por %p619_p8, %p618_p5 }
  0x1a   : > { %p616_p7 = pneg %p615_p4 }
  0x1c   : > { %p621_p9 = pnand %p620_p10, %p616_p7 }
  0x1e   : > { %624 = shalt.err (!%p621_p9)
}
  0x1f   : > { %s708_s26 = smov 256   ;;  %s709_s28 = smov 16  }
  0x20   : > { %554 = dma.hbm_to_vmem [thread:$0]  (!%p797_p13), %s148_s5, 2048, %s150_s7, %s138_s9, %s708_s26, %s708_s26, %s709_s28  }
  0x21   : > { %p158_p2 = pnand %p534_p0, %p157_p1 }
  0x22   : > { %s818_s29 = sand.u32 (!%p158_p2), 1, %s698_s13  }
  0x23   : > { %161 = sbr.rel (%p158_p2) target bundleno = 622 (0x26e), region = 32  ;;  %s535_s30 = sshll.u32 (!%p158_p2), %s818_s29, 7 }
  0x24   : > { %s164_s4 = scalar_lea.sflag (!%p158_p2), [#allocation3], %s818_s29  ;;  %s167_s6 = scalar_lea.vmem (!%p158_p2), [#allocation2], %s535_s30 }
  0x28   : > { %685 = dma.done.wait (%p775_p6), %s164_s4, 2048  }
  0x29   : > { %687 = vsyncadd (%p775_p6), %s164_s4, 4294965248  ;;  %v828_v0 = vld [vmem:[%s167_s6] sm:$0xff]  ;;  %v830_v1 = vld [vmem:[%s167_s6 + $0x8] sm:$0xff]  ;;  %v255_v32 = vlaneseq  ;;  %vm260_vm0 = vcmask 130112   ;;  %vm264_vm1 = vcmask 195712   ;;  %vm268_vm2 = vcmask 261312  }
  0x2a   : > { %v832_v2 = vld [vmem:[%s167_s6 + $0x20] sm:$0xff]  ;;  %v207_v3 = vadd.f32 %v830_v1, %v828_v0  ;;  %v836_v4 = vld [vmem:[%s167_s6 + $0x28] sm:$0xff]  ;;  %v846_v9 = vld [vmem:[%s167_s6 + $0x10] sm:$0xff]  ;;  %vm272_vm3 = vcmask 326912   ;;  %vm276_vm4 = vcmask 392512   ;;  %vm280_vm5 = vcmask 458112  }
  0x2b   : > { %v838_v5 = vld [vmem:[%s167_s6 + $0x40] sm:$0xff]  ;;  %v840_v6 = vld [vmem:[%s167_s6 + $0x48] sm:$0xff]  ;;  %v213_v7 = vadd.f32 %v836_v4, %v832_v2  ;;  %v848_v10 = vld [vmem:[%s167_s6 + $0x18] sm:$0xff]  ;;  %v256_v36 = vand.u32 127, %v255_v32  ;;  %vm284_vm6 = vcmask 523712   ;;  %vm286_vm7 = vcmask 523264  }
  0x2c   : > { %v219_v8 = vadd.f32 %v840_v6, %v838_v5  ;;  %208 = vadd.xlane.f32.xlu0 %v207_v3  ;;  %v850_v11 = vld [vmem:[%s167_s6 + $0x30] sm:$0xff]  ;;  %v852_v12 = vld [vmem:[%s167_s6 + $0x38] sm:$0xff]  ;;  %v210_v15 = vadd.f32 %v848_v10, %v846_v9  ;;  %v864_v18 = vld [vmem:[%s167_s6 + $0x60] sm:$0xff]  ;;  %vm315_vm8 = vcmask 1043456   ;;  %vm311_vm9 = vcmask 31744   ;;  %s907_s7 = scalar_lea.vmem [#allocation5], %s535_s30 }
  0x2d   : > { %214 = vadd.xlane.f32.xlu1 %v213_v7  ;;  %v854_v13 = vld [vmem:[%s167_s6 + $0x50] sm:$0xff]  ;;  %v856_v14 = vld [vmem:[%s167_s6 + $0x58] sm:$0xff]  ;;  %v216_v16 = vadd.f32 %v852_v12, %v850_v11  ;;  %v866_v19 = vld [vmem:[%s167_s6 + $0x68] sm:$0xff]  ;;  %v258_v38 = vadd.s32 4294967288, %v256_v36  ;;  %v262_v39 = vadd.s32 4294967280, %v256_v36  ;;  %v266_v42 = vadd.s32 4294967272, %v256_v36 }
  0x2e   : > { %220 = vadd.xlane.f32.xlu2 %v219_v8  ;;  %v222_v17 = vadd.f32 %v856_v14, %v854_v13  ;;  %v868_v20 = vld [vmem:[%s167_s6 + $0x70] sm:$0xff]  ;;  %v870_v21 = vld [vmem:[%s167_s6 + $0x78] sm:$0xff]  ;;  %v225_v22 = vadd.f32 %v866_v19, %v864_v18  ;;  %v244_v26 = vld [vmem:[%s974_s1 + $0x28] sm:$0xff]  ;;  %v270_v46 = vadd.s32 4294967264, %v256_v36  ;;  %v274_v53 = vadd.s32 4294967256, %v256_v36  ;;  %s546_s30 = sshll.u32 %s753_s16, 7 }
  0x2f   : > { %v228_v23 = vadd.f32 %v870_v21, %v868_v20  ;;  %v246_v24 = vld [vmem:[%s974_s1 + $0x38] sm:$0xff]  ;;  %v245_v25 = vld [vmem:[%s974_s1 + $0x30] sm:$0xff]  ;;  %v243_v27 = vld [vmem:[%s974_s1 + $0x20] sm:$0xff]  ;;  %v278_v59 = vadd.s32 4294967248, %v256_v36  ;;  %v282_v62 = vadd.s32 4294967240, %v256_v36  ;;  %s451_s10 = scalar_lea.hbm %s976_s3, %s546_s30  ;;  %s452_s11 = sshll.u32 %s907_s7, 4  ;;  %s453_s11 = int_to_ptr.vmem [resolvable:$true] %s452_s11 }
  0x30   : > { %297 = vmatpush.msra.mxu0 %v246_v24  ;;  %v242_v28 = vld [vmem:[%s974_s1 + $0x18] sm:$0xff]  ;;  %v241_v29 = vld [vmem:[%s974_s1 + $0x10] sm:$0xff]  ;;  %v240_v30 = vld [vmem:[%s974_s1 + $0x8] sm:$0xff]  ;;  %s454_s17 = sshll.u32 %s451_s10, 4  ;;  %s440_s16 = scalar_lea.sflag [#allocation4], %s818_s29  ;;  %s455_s17 = int_to_ptr.hbm [resolvable:$true] %s454_s17 }
  0x31   : > { %v239_v31 = vld [vmem:[%s974_s1] sm:$0xff]  ;;  %s654_s19 = sshra.s32 %s455_s17, 4  ;;  %s660_s26 = scalar_lea.hbm %s976_s3, 256  ;;  %s655_s19 = int_to_ptr.hbm [resolvable:$true] %s654_s19 }
  0x32   : > { %298 = vmatpush.msra.mxu0 %v245_v25  ;;  %v310_v24 = vld [vmem:[%s975_s2] sm:$0xf]  ;;  %s656_s20 = scalar_lea.hbm %s655_s19, 128  ;;  %p661_p0 = scmp.lt.s32.totalorder %s655_s19, %s976_s3 }
  0x33   : > { %538 = vmatpush.msk.msra.mxu1 %vm315_vm8, %v310_v24  ;;  %p657_p6 = scmp.ne.s32.totalorder %s655_s19, %s656_s20  ;;  %p662_p1 = scmp.lt.s32.totalorder %s660_s26, %s656_s20 }
  0x34   : > { %211 = vadd.xlane.f32.xlu0 %v210_v15  ;;  %299 = vmatpush.msra.mxu0 %v244_v26 }
  0x35   : > { %217 = vadd.xlane.f32.xlu1 %v216_v16  ;;  %p658_p9 = pnand %p657_p6, %p782_p11  ;;  %p663_p3 = por %p662_p1, %p661_p0 }
  0x36   : > { %223 = vadd.xlane.f32.xlu2 %v222_v17  ;;  %300 = vmatpush.msra.mxu0 %v243_v27  ;;  %v360_v27 = vshrl.u32 %v255_v32, 7 }
  0x37   : > { %p659_p13 = pneg %p658_p9 }
  0x38   : > { %301 = vmatpush.msra.mxu0 %v242_v28  ;;  %597 = vset.pattern.permute.xlu2 %v360_v27  ;;  %v373_v28 = vadd.s32 16, %v360_v27 }
  0x39   : > { %p664_p4 = pnand %p663_p3, %p659_p13 }
  0x3a   : > { %302 = vmatpush.msra.mxu0 %v241_v29  ;;  %v367_v29 = vadd.s32 8, %v360_v27  ;;  %599 = vset.pattern.permute.xlu1 %v373_v28 }
  0x3c   : > { %226 = vadd.xlane.f32.xlu0 %v225_v22  ;;  %303 = vmatpush.msra.mxu0 %v240_v30 }
  0x3d   : > { %229 = vadd.xlane.f32.xlu1 %v228_v23  ;;  %598 = vset.pattern.permute.xlu0 %v367_v29 }
  0x3e   : > { %304 = vmatpush.msra.mxu0 %v239_v31 }
  0x9f   : > { %v209_v33 = vpop.xlane.xlu0 %208 }
  0xa0   : > { %v215_v34 = vpop.xlane.xlu1 %214  ;;  %v231_v37 = vmul.f32 0.00390625, %v209_v33 }
  0xa1   : > { %v221_v35 = vpop.xlane.xlu2 %220  ;;  %v233_v40 = vmul.f32 0.00390625, %v215_v34 }
  0xa2   : > { %v257_v48 = vperm.slane %v231_v37, %v256_v36  ;;  %v235_v49 = vmul.f32 0.00390625, %v221_v35 }
  0xa3   : > { %v263_v51 = vperm.slane %v233_v40, %v262_v39 }
  0xa4   : > { %v271_v57 = vperm.slane %v235_v49, %v270_v46  ;;  %v391_v46 = vadd.s32 40, %v360_v27  ;;  %v385_v49 = vadd.s32 32, %v360_v27 }
  0xa7   : > { %v212_v41 = vpop.xlane.xlu0 %211 }
  0xa8   : > { %v232_v43 = vmul.f32 0.00390625, %v212_v41  ;;  %v218_v44 = vpop.xlane.xlu1 %217 }
  0xa9   : > { %v224_v45 = vpop.xlane.xlu2 %223  ;;  %v234_v47 = vmul.f32 0.00390625, %v218_v44 }
  0xaa   : > { %v259_v50 = vperm.slane %v232_v43, %v258_v38  ;;  %v236_v54 = vmul.f32 0.00390625, %v224_v45 }
  0xab   : > { %v267_v52 = vperm.slane %v234_v47, %v266_v42  ;;  %v379_v47 = vadd.s32 24, %v360_v27 }
  0xac   : > { %v261_v55 = vsel %vm260_vm0, %v259_v50, %v257_v48  ;;  %v275_v60 = vperm.slane %v236_v54, %v274_v53  ;;  %v403_v48 = vadd.s32 56, %v360_v27  ;;  %v397_v50 = vadd.s32 48, %v360_v27 }
  0xad   : > { %v265_v56 = vsel %vm264_vm1, %v263_v51, %v261_v55 }
  0xae   : > { %v269_v58 = vsel %vm268_vm2, %v267_v52, %v265_v56 }
  0xaf   : > { %v227_v61 = vpop.xlane.xlu0 %226  ;;  %v273_v7 = vsel %vm272_vm3, %v271_v57, %v269_v58 }
  0xb0   : > { %v237_v63 = vmul.f32 0.00390625, %v227_v61  ;;  %v230_v3 = vpop.xlane.xlu1 %229  ;;  %v277_v17 = vsel %vm276_vm4, %v275_v60, %v273_v7 }
  0xb1   : > { %v238_v8 = vmul.f32 0.00390625, %v230_v3 }
  0xb2   : > { %v279_v15 = vperm.slane %v237_v63, %v278_v59 }
  0xb3   : > { %v283_v16 = vperm.slane %v238_v8, %v282_v62 }
  0xb4   : > { %v281_v22 = vsel %vm280_vm5, %v279_v15, %v277_v17 }
  0xb5   : > { %v285_v23 = vsel %vm284_vm6, %v283_v16, %v281_v22 }
  0xb6   : > { %537 = vmatmul.msk.f32.vlgmr.msra.gmra.mxu0 %vm286_vm7, %v285_v23 }
 0x133   : > { %v306_v25 = vpop.f32.mrf.mxu0 }
 0x134   : > { %v309_v26 = vmax.f32 %v306_v25, 0.0 }
 0x136   : > { %539 = vmatmul.msk.f32.vlgmr.msra.gmra.mxu1 %vm311_vm9, %v309_v26 }
 0x1b3   : > { %v336_v30 = vpop.f32.mrf.mxu1 }
 0x1b4   : > { %v339_v31 = vsub.f32 0.0, %v336_v30 }
 0x1b6   : > { %v340_v33 = vmul.f32 1.442695, %v339_v31 }
 0x1b8   : > { %606 = vpow2.f32 %v340_v33 }
 0x1be   : > { %v607_v34 = vpop.eup %606 }
 0x1bf   : > { %v342_v35 = vadd.f32 1.0, %v607_v34 }
 0x1c1   : > { %608 = vrcp.f32 %v342_v35  ;;  %v354_v39 = vand.u32 2147483648, %v342_v35  ;;  %v352_v41 = vand.u32 2147483647, %v342_v35  ;;  %vm348_vm11 = vweird.f32 %v342_v35 }
 0x1c3   : > { %v355_v42 = vor.u32 1.1754944e-38, %v354_v39  ;;  %vm353_vm13 = vcmp.eq.f32.partialorder %v352_v41, 8.507059e+37 }
 0x1c7   : > { %v609_v36 = vpop.eup %608 }
 0x1c8   : > { %v344_v37 = vmul.f32 %v609_v36, %v342_v35  ;;  %vm349_vm10 = vweird.f32 %v609_v36 }
 0x1c9   : > { %vm350_vm12 = vmor %vm348_vm11, %vm349_vm10 }
 0x1ca   : > { %v345_v38 = vsub.f32 1.0, %v344_v37 }
 0x1cc   : > { %v346_v40 = vmul.f32 %v609_v36, %v345_v38 }
 0x1ce   : > { %v347_v32 = vadd.f32 %v609_v36, %v346_v40 }
 0x1d0   : > { %v351_v43 = vsel %vm350_vm12, %v609_v36, %v347_v32 }
 0x1d1   : > { %v356_v44 = vsel %vm353_vm13, %v355_v42, %v351_v43 }
 0x1d2   : > { %v358_v45 = vperm.slane %v356_v44, 0 }
 0x1d4   : > { %375 = vperm.xlu1 %599, %v358_v45   ;;  %369 = vperm.xlu0 %598, %v358_v45  }
 0x1d5   : > { %363 = vperm.xlu2 %597, %v358_v45  }
 0x1dc   : > { %602 = vset.pattern.permute.xlu1 %v391_v46  ;;  %605 = vset.pattern.permute.xlu0 %v403_v48 }
 0x1dd   : > { %600 = vset.pattern.permute.xlu2 %v379_v47 }
 0x1e4   : > { %393 = vperm.xlu1 %602, %v358_v45  }
 0x1e5   : > { %381 = vperm.xlu2 %600, %v358_v45  }
 0x1ec   : > { %604 = vset.pattern.permute.xlu1 %v403_v48 }
 0x1ed   : > { %601 = vset.pattern.permute.xlu2 %v385_v49 }
 0x1f4   : > { %405 = vperm.xlu1 %604, %v358_v45  }
 0x1f5   : > { %387 = vperm.xlu2 %601, %v358_v45  }
 0x1fd   : > { %603 = vset.pattern.permute.xlu2 %v397_v50 }
 0x205   : > { %399 = vperm.xlu2 %603, %v358_v45  }
 0x22f   : > { %v364_v51 = vpop.permute.xlu2 %363 }
 0x230   : > { %v407_v52 = vmul.f32 %v364_v51, %v828_v0  ;;  %v408_v53 = vmul.f32 %v364_v51, %v830_v1 }
 0x232   : > { %423 = vst [vmem:[%s907_s7] sm:$0xff] %v407_v52 }
 0x233   : > { %424 = vst [vmem:[%s907_s7 + $0x8] sm:$0xff] %v408_v53 }
 0x23f   : > { %v382_v54 = vpop.permute.xlu2 %381 }
 0x240   : > { %v413_v55 = vmul.f32 %v382_v54, %v850_v11  ;;  %v414_v0 = vmul.f32 %v382_v54, %v852_v12 }
 0x242   : > { %429 = vst [vmem:[%s907_s7 + $0x30] sm:$0xff] %v413_v55 }
 0x243   : > { %430 = vst [vmem:[%s907_s7 + $0x38] sm:$0xff] %v414_v0 }
 0x246   : > { %v376_v1 = vpop.permute.xlu1 %375  ;;  %v370_v56 = vpop.permute.xlu0 %369 }
 0x247   : > { %v411_v57 = vmul.f32 %v376_v1, %v832_v2  ;;  %v412_v58 = vmul.f32 %v376_v1, %v836_v4  ;;  %v409_v59 = vmul.f32 %v370_v56, %v846_v9  ;;  %v410_v60 = vmul.f32 %v370_v56, %v848_v10 }
 0x249   : > { %427 = vst [vmem:[%s907_s7 + $0x20] sm:$0xff] %v411_v57 }
 0x24a   : > { %428 = vst [vmem:[%s907_s7 + $0x28] sm:$0xff] %v412_v58 }
 0x24b   : > { %425 = vst [vmem:[%s907_s7 + $0x10] sm:$0xff] %v409_v59 }
 0x24c   : > { %426 = vst [vmem:[%s907_s7 + $0x18] sm:$0xff] %v410_v60 }
 0x24f   : > { %v388_v11 = vpop.permute.xlu2 %387 }
 0x250   : > { %v415_v12 = vmul.f32 %v388_v11, %v838_v5  ;;  %v416_v2 = vmul.f32 %v388_v11, %v840_v6 }
 0x252   : > { %431 = vst [vmem:[%s907_s7 + $0x40] sm:$0xff] %v415_v12 }
 0x253   : > { %432 = vst [vmem:[%s907_s7 + $0x48] sm:$0xff] %v416_v2 }
 0x256   : > { %v394_v4 = vpop.permute.xlu1 %393 }
 0x257   : > { %v417_v9 = vmul.f32 %v394_v4, %v854_v13  ;;  %v418_v61 = vmul.f32 %v394_v4, %v856_v14 }
 0x259   : > { %433 = vst [vmem:[%s907_s7 + $0x50] sm:$0xff] %v417_v9 }
 0x25a   : > { %434 = vst [vmem:[%s907_s7 + $0x58] sm:$0xff] %v418_v61 }
 0x25f   : > { %v400_v10 = vpop.permute.xlu2 %399 }
 0x260   : > { %v419_v62 = vmul.f32 %v400_v10, %v864_v18  ;;  %v420_v5 = vmul.f32 %v400_v10, %v866_v19 }
 0x262   : > { %435 = vst [vmem:[%s907_s7 + $0x60] sm:$0xff] %v419_v62 }
 0x263   : > { %436 = vst [vmem:[%s907_s7 + $0x68] sm:$0xff] %v420_v5 }
 0x266   : > { %v406_v6 = vpop.permute.xlu1 %405 }
 0x267   : > { %v421_v13 = vmul.f32 %v406_v6, %v868_v20  ;;  %v422_v14 = vmul.f32 %v406_v6, %v870_v21 }
 0x269   : > { %437 = vst [vmem:[%s907_s7 + $0x70] sm:$0xff] %v421_v13 }
 0x26a   : > { %438 = vst [vmem:[%s907_s7 + $0x78] sm:$0xff] %v422_v14 }
 0x26b   : > { %667 = shalt.err (!%p664_p4)
}
 0x26c   : > { %s710_s29 = smov 256   ;;  %s711_s6 = smov 16  }
 0x26d   : > { %549 = dma.vmem_to_hbm [thread:$0]  (%p782_p11), %s453_s11, 2048, %s455_s17, %s440_s16, %s710_s29, %s710_s29, %s711_s6  }
 0x26e PF: > { %s469_s23 = sand.u32 1, %s694_s12   ;;  %p982_p7 = scmp.ge.s32.totalorder %s706_s15, 2 }
 0x26f   : > { %s470_s5 = scalar_lea.sflag [#allocation4], %s469_s23 }
 0x270   : > { %p556_p5 = pnand %p982_p7, %p786_p12 }
 0x272   : > { %p557_p8 = pneg %p556_p5 }
 0x274   : > { %689 = dma.done.wait (%p557_p8), %s470_s5, 2048  }
 0x275   : > { %691 = vsyncadd (%p557_p8), %s470_s5, 4294965248  ;;  %p16_p10 = scmp.ge.s32.totalorder %s757_s18, 4   ;;  %s983_s12 = smov %s698_s13 }
 0x276   : > { %s984_s13 = smov %s702_s14  ;;  %s985_s14 = smov %s769_s21 }
 0x277   : > { %s986_s15 = smov %s757_s18  ;;  %18 = sbr.rel (!%p16_p10) target bundleno = 5 (0x5), region = 77 }
 0x27c   :  { %476 = vsyncpa [#allocation3], 1 }
 0x27d   :  { %478 = vsyncpa [#allocation3 + $0x1], 1 }
 0x27e   :  { %479 = vsyncpa [#allocation4], 1 }
 0x27f   :  { %481 = vsyncpa [#allocation4 + $0x1], 1 }

</bundles_post_ra>
